<compile_context>
chip_gen: v5e
topology: v5e:2x2
jax: 0.10.0
libtpu: 0.0.40
codegen_flags: <defaults>
</compile_context>

<pallas_src>
import jax
import jax.numpy as jnp
from jax.experimental import pallas as pl
from jax.experimental.pallas import tpu as pltpu


def _round_up(x, m):
    return ((x + m - 1) // m) * m


def _tpu_defaults():
    """Generation-dependent tuning: (ncores, tn_max, vmem_limit_bytes)."""
    # v5e / v6e: single TensorCore, 128 MiB VMEM -> big tiles, generous limit.
    ncores, tn_max, vmem = 1, 1024, 96 * 1024 * 1024
    try:
        kind = jax.devices()[0].device_kind.lower()
    except Exception:
        kind = ""
    if "v7" in kind or "7x" in kind:
        # v7x: 2 TensorCores per chip but only 64 MiB VMEM per core.
        ncores, tn_max, vmem = 2, 512, 48 * 1024 * 1024
    try:  # clamp against the real VMEM capacity when the query is available
        cap = pltpu.get_tpu_info().vmem_capacity_bytes
        vmem = min(vmem, (cap * 3) // 4)
    except Exception:
        pass
    return ncores, tn_max, vmem


# ----------------------------------------------------------------------------
# Fused kernel.  Per (core, row-tile):
#   x      = even-frame slice of the [even|odd] packed feature row  (bf16)
#   logits = [x @ W_s + b_s | x @ W_t + b_t]        (one MXU matmul, f32 acc)
#   accumulate hard_sum / teacher_sum / kl_sum / valid_cnt into a per-core
#   lane-padded accumulator; optionally write bf16 logits tiles out.
# ----------------------------------------------------------------------------
def _make_kd_kernel(*, inv_temp, n_real, d, cp, emit_logits):
    def kernel(x_ref, w_ref, b_ref, lab_ref, *out_refs):
        if emit_logits:
            s_out_ref, t_out_ref, acc_ref = out_refs
        else:
            (acc_ref,) = out_refs

        ci = pl.program_id(0)          # core-parallel axis
        ji = pl.program_id(1)          # row-tile axis (reduction, "arbitrary")

        @pl.when(ji == 0)
        def _():
            acc_ref[...] = jnp.zeros_like(acc_ref)

        tn = x_ref.shape[0]

        # even-frame select (static lane slice; identity when the DMA already
        # fetched only the even-frame columns) + bf16 cast right before MXU.
        x = x_ref[:, :d].astype(jnp.bfloat16)

        logits = (jnp.dot(x, w_ref[...], preferred_element_type=jnp.float32)
                  + b_ref[...])                               # (tn, 2*cp) f32
        s = logits[:, :cp]                                    # student logits
        t = logits[:, cp:]                                    # teacher logits

        if emit_logits:
            s_out_ref[...] = s.astype(jnp.bfloat16)
            t_out_ref[...] = t.astype(jnp.bfloat16)

        lab = lab_ref[...]                                    # (tn, 1) int32

        # rows past n_real (ragged last tile) hold garbage; mask them out.
        base = (ci * pl.num_programs(1) + ji) * tn
        row_ids = base + jax.lax.broadcasted_iota(jnp.int32, (tn, 1), 0)
        row_valid = row_ids < n_real                          # (tn, 1) bool
        valid = jnp.logical_and(row_valid, lab != -100)       # CE ignore_index

        # hard-CE picked logit via masked select (no f32 one-hot temporary)
        cls = jax.lax.broadcasted_iota(jnp.int32, s.shape, 1)
        picked = cls == lab                                    # (tn, cp) bool
        s_lab = jnp.sum(jnp.where(picked, s, 0.0), axis=-1, keepdims=True)
        t_lab = jnp.sum(jnp.where(picked, t, 0.0), axis=-1, keepdims=True)

        def lse(v):
            m = jnp.max(v, axis=-1, keepdims=True)
            return m + jnp.log(jnp.sum(jnp.exp(v - m), axis=-1, keepdims=True))

        hard_rows = lse(s) - s_lab                             # CE per row
        teach_rows = lse(t) - t_lab                            # teacher CE per row

        # temperature-scaled KL; reuse exp(z_t) for both log_softmax and p_t.
        zs = s * inv_temp
        ms = jnp.max(zs, axis=-1, keepdims=True)
        es = jnp.exp(zs - ms)
        ss = jnp.sum(es, axis=-1, keepdims=True)
        ls_s = (zs - ms) - jnp.log(ss)

        zt = t * inv_temp
        mt = jnp.max(zt, axis=-1, keepdims=True)
        et = jnp.exp(zt - mt)
        st = jnp.sum(et, axis=-1, keepdims=True)
        ls_t = (zt - mt) - jnp.log(st)
        p_t = et * pl.reciprocal(st, approx=True)              # EUP slot, ~free

        kl_rows = jnp.sum(p_t * (ls_t - ls_s), axis=-1, keepdims=True)

        # jnp.where (not multiply) so NaN/garbage rows never reach the sums.
        hard_sum = jnp.sum(jnp.where(valid, hard_rows, 0.0))
        teach_sum = jnp.sum(jnp.where(valid, teach_rows, 0.0))
        kl_sum = jnp.sum(jnp.where(row_valid, kl_rows, 0.0))
        cnt_sum = jnp.sum(jnp.where(valid, 1.0, 0.0))

        # single lane-padded accumulator: lanes 0..3 carry the partial sums
        lane = jax.lax.broadcasted_iota(jnp.int32, acc_ref.shape, 2)
        upd = (jnp.where(lane == 0, hard_sum, 0.0)
               + jnp.where(lane == 1, teach_sum, 0.0)
               + jnp.where(lane == 2, kl_sum, 0.0)
               + jnp.where(lane == 3, cnt_sum, 0.0))
        acc_ref[...] += upd

    return kernel


# ----------------------------------------------------------------------------
# Wrapper: lane-align classes, pick tiling per TPU generation, call the kernel.
# ----------------------------------------------------------------------------
def fused_projection_kd_loss(feat_pairs, feat_dim, labels, w_s, b_s, w_t, b_t,
                             *, temp, alpha, emit_logits=True,
                             ncores=None, tn_max=None, vmem_limit=None):
    n = feat_pairs.shape[0]
    d = feat_dim
    assert feat_pairs.shape[1] == 2 * d
    c = w_s.shape[1]

    auto_ncores, auto_tn, auto_vmem = _tpu_defaults()
    ncores = auto_ncores if ncores is None else ncores
    tn_max = auto_tn if tn_max is None else tn_max
    vmem_limit = auto_vmem if vmem_limit is None else vmem_limit

    # lane-align the class axis; padded classes get a -1e9 bias so they carry
    # exactly zero softmax mass (all softmax/exp math stays f32).
    # NOTE: for production MelHuBERT, D=768 and C a multiple of 128 keep every
    # MXU pass full and the post-kernel slices no-ops; D here is just a guard.
    cp = _round_up(c, 128)
    if cp != c:
        w_s = jnp.pad(w_s, ((0, 0), (0, cp - c)))
        w_t = jnp.pad(w_t, ((0, 0), (0, cp - c)))
        b_s = jnp.pad(b_s, (0, cp - c), constant_values=-1e9)
        b_t = jnp.pad(b_t, (0, cp - c), constant_values=-1e9)
    w = jnp.concatenate([w_s, w_t], axis=1).astype(jnp.bfloat16)        # (d, 2cp)
    b = jnp.concatenate([b_s, b_t], axis=0).reshape(1, 2 * cp).astype(jnp.float32)

    # row tiling: biggest tile that fits, NO feature padding -- the ragged last
    # tile is masked in-kernel.  Keep block indices in-bounds by requiring the
    # total tile count to split evenly across cores (else fall back to 1 core).
    tn = min(_round_up(tn_max, 16), _round_up(n, 16))
    total_tiles = pl.cdiv(n, tn)
    if ncores > 1 and total_tiles % ncores != 0:
        for cand in range(tn - 16, max(16, tn - 8 * 16) - 1, -16):
            if pl.cdiv(n, cand) % ncores == 0:
                tn, total_tiles = cand, pl.cdiv(n, cand)
                break
        else:
            ncores = 1
    tiles_per_core = total_tiles // ncores

    # when D is lane-aligned the DMA fetches only the even-frame columns
    # (halving the input stream); otherwise fetch the [even|odd] pair and
    # lane-slice in VMEM.
    col_block = d if d % 128 == 0 else 2 * d

    labels2 = labels.astype(jnp.int32).reshape(n, 1)

    row_map = lambda ci, ji: (ci * tiles_per_core + ji, 0)
    acc_map = lambda ci, ji: (ci, 0, 0)

    # on the 2-core (v7x) path reclaim the second VMEM copy of the resident
    # weight/bias blocks (constant index map -> no prefetch needed).
    single_buf = ncores > 1

    def resident(shape):
        if single_buf:
            try:
                return pl.BlockSpec(shape, lambda ci, ji: (0, 0),
                                    pipeline_mode=pl.Buffered(1))
            except TypeError:
                pass
        return pl.BlockSpec(shape, lambda ci, ji: (0, 0))

    kernel = _make_kd_kernel(inv_temp=float(1.0 / temp), n_real=n, d=d, cp=cp,
                             emit_logits=emit_logits)

    acc_shape = jax.ShapeDtypeStruct((ncores, 8, 128), jnp.float32)
    acc_spec = pl.BlockSpec((1, 8, 128), acc_map)
    if emit_logits:
        out_shape = (jax.ShapeDtypeStruct((n, cp), jnp.bfloat16),
                     jax.ShapeDtypeStruct((n, cp), jnp.bfloat16),
                     acc_shape)
        out_specs = (pl.BlockSpec((tn, cp), row_map),
                     pl.BlockSpec((tn, cp), row_map),
                     acc_spec)
    else:
        out_shape = (acc_shape,)
        out_specs = (acc_spec,)

    outs = pl.pallas_call(
        kernel,
        out_shape=out_shape,
        grid_spec=pltpu.PrefetchScalarGridSpec(
            num_scalar_prefetch=0,
            grid=(ncores, tiles_per_core),
            in_specs=[
                pl.BlockSpec((tn, col_block), row_map),   # raw [even|odd] rows
                resident((d, 2 * cp)),                    # fused W (resident)
                resident((1, 2 * cp)),                    # fused bias (resident)
                pl.BlockSpec((tn, 1), row_map),           # labels tile
            ],
            out_specs=out_specs,
        ),
        compiler_params=pltpu.CompilerParams(
            dimension_semantics=("parallel", "arbitrary"),
            vmem_limit_bytes=vmem_limit,
        ),
    )(feat_pairs, w, b, labels2)

    if emit_logits:
        s_logits, t_logits, acc = outs
    else:
        (acc,) = outs
        s_logits = t_logits = None

    sums = jnp.sum(acc[:, 0, :], axis=0)            # combine per-core partials
    hard_sum, teach_sum, kl_sum, cnt = sums[0], sums[1], sums[2], sums[3]

    # matches torch CE(ignore_index=-100, mean): NaN if every label is ignored.
    hard_loss = hard_sum / cnt
    teacher_loss = teach_sum / cnt
    soft_loss = kl_sum / jnp.float32(n)             # KLDivLoss(batchmean)
    total_loss = hard_loss * (1.0 - alpha) + soft_loss * alpha

    if emit_logits and cp != c:
        s_logits = s_logits[:, :c]
        t_logits = t_logits[:, :c]
    return total_loss, hard_loss, soft_loss, teacher_loss, s_logits, t_logits


# ----------------------------------------------------------------------------
# Distiller forward: free [even|odd] view of the frames, fused projection + KD
# loss.  loss_type == 'masked': teacher mask_indices = even frames.
# ----------------------------------------------------------------------------
def melhubert_distiller_forward(audio_feat, label, pad_mask, params, *,
                                loss_temp, loss_alpha, emit_logits=True):
    # TODO(synk): the MelHuBERT transformer encoders (student/teacher) and the
    # teacher checkpoint load are not reproduced here; both models are stood in
    # for by deterministic linear projection heads.
    B, T, D = audio_feat.shape
    n = B * T // 2
    feat_pairs = audio_feat.reshape(n, 2 * D)     # free view: [even|odd] per row
    label_m = label.reshape(n, 2)[:, 0]

    total, hard, soft, teacher, logit_m, t_logit_m = fused_projection_kd_loss(
        feat_pairs, D, label_m,
        params["w_student"], params["b_student"],
        params["w_teacher"], params["b_teacher"],
        temp=loss_temp, alpha=loss_alpha, emit_logits=emit_logits)
    return total, hard, soft, teacher, logit_m, t_logit_m, label_m


# ----------------------------------------------------------------------------
# Pure-JAX reference for loss_fn_kd (validates kernel semantics).
# ----------------------------------------------------------------------------
def ref_kd_loss(s, t, lab, temp, alpha):
    valid = lab != -100
    lab_safe = jnp.where(valid, lab, 0)
    ls_s = jax.nn.log_softmax(s, axis=-1)
    ls_t = jax.nn.log_softmax(t, axis=-1)
    pick = lambda ls: jnp.take_along_axis(ls, lab_safe[:, None], axis=-1)[:, 0]
    nvalid = jnp.sum(valid)
    hard = -jnp.sum(jnp.where(valid, pick(ls_s), 0.0)) / nvalid
    teacher = -jnp.sum(jnp.where(valid, pick(ls_t), 0.0)) / nvalid
    p_t = jax.nn.softmax(t / temp, axis=-1)
    soft = jnp.sum(
        p_t * (jnp.log(p_t) - jax.nn.log_softmax(s / temp, axis=-1))
    ) / s.shape[0]
    total = hard * (1.0 - alpha) + soft * alpha
    return total, hard, soft, teacher


if __name__ == "__main__":
    key = jax.random.PRNGKey(0)
    B, T, D, C = 2, 16, 32, 128          # batch, frames, feat dim, num clusters
    LOSS_TEMP, LOSS_ALPHA = 4.0, 0.5     # upstream_config['loss_param']

    k = jax.random.split(key, 6)
    audio_feat = jax.random.normal(k[0], (B, T, D), dtype=jnp.float32)
    label = jax.random.randint(k[1], (B, T), 0, C, dtype=jnp.int32)
    # a couple of ignore_index labels to exercise CE masking
    label = label.at[0, 0].set(-100).at[1, 4].set(-100)
    pad_mask = jnp.ones((B, T), dtype=jnp.float32)

    params = {
        "w_student": 0.3 * jax.random.normal(k[2], (D, C), dtype=jnp.float32),
        "b_student": 0.05 * jax.random.normal(k[3], (C,), dtype=jnp.float32),
        "w_teacher": 0.3 * jax.random.normal(k[4], (D, C), dtype=jnp.float32),
        "b_teacher": 0.05 * jax.random.normal(k[5], (C,), dtype=jnp.float32),
    }

    total, hard, soft, teacher, logit_m, t_logit_m, label_m = (
        melhubert_distiller_forward(
            audio_feat, label, pad_mask, params,
            loss_temp=LOSS_TEMP, loss_alpha=LOSS_ALPHA,
        )
    )
    jax.block_until_ready(total)

    # reference projection (same bf16-input / f32-accumulate contract)
    feat_m = audio_feat.reshape(B * T // 2, 2, D)[:, 0, :]
    x16 = feat_m.astype(jnp.bfloat16)
    ref_s = (jnp.dot(x16, params["w_student"].astype(jnp.bfloat16),
                     preferred_element_type=jnp.float32) + params["b_student"])
    ref_t = (jnp.dot(x16, params["w_teacher"].astype(jnp.bfloat16),
                     preferred_element_type=jnp.float32) + params["b_teacher"])

    # 1) bf16 logits output matches the f32 reference up to bf16 rounding
    assert jnp.allclose(logit_m.astype(jnp.float32), ref_s, atol=3e-2, rtol=3e-2)
    assert jnp.allclose(t_logit_m.astype(jnp.float32), ref_t, atol=3e-2, rtol=3e-2)

    # 2) the fused loss matches the pure-JAX loss_fn_kd reference
    label_m_ref = label.reshape(B * T // 2, 2)[:, 0]
    r_total, r_hard, r_soft, r_teacher = ref_kd_loss(
        ref_s, ref_t, label_m_ref, LOSS_TEMP, LOSS_ALPHA
    )
    for a, b in ((total, r_total), (hard, r_hard),
                 (soft, r_soft), (teacher, r_teacher)):
        assert jnp.allclose(a, b, atol=2e-3, rtol=2e-3), (a, b)

    # 3) loss-only path (no logits writeback) gives the same total loss
    total2, *_ = melhubert_distiller_forward(
        audio_feat, label, pad_mask, params,
        loss_temp=LOSS_TEMP, loss_alpha=LOSS_ALPHA, emit_logits=False,
    )
    jax.block_until_ready(total2)
    assert jnp.allclose(total, total2, atol=1e-5, rtol=1e-5)

    print("KERNEL_OK")
</pallas_src>

<mosaic_0001>
module attributes {stable_mosaic.version = 11 : i64} {
  func.func @kernel(%arg0: i32, %arg1: i32, %arg2: memref<16x64xf32, #tpu.memory_space<vmem>>, %arg3: memref<32x256xbf16, #tpu.memory_space<vmem>>, %arg4: memref<1x256xf32, #tpu.memory_space<vmem>>, %arg5: memref<16x1xi32, #tpu.memory_space<vmem>>, %arg6: memref<16x128xbf16, #tpu.memory_space<vmem>>, %arg7: memref<16x128xbf16, #tpu.memory_space<vmem>>, %arg8: memref<1x8x128xf32, #tpu.memory_space<vmem>>) attributes {dimension_semantics = [#tpu.dimension_semantics<parallel>, #tpu.dimension_semantics<arbitrary>], iteration_bounds = array<i64: 1, 1>, scalar_prefetch = 0 : i64, scratch_operands = 0 : i64, tpu.core_type = #tpu.core_type<tc>, window_params = [{transform_indices = @transform_0, window_bounds = array<i64: 16, 64>}, {pipeline_mode = #tpu.pipeline_mode<synchronous>, transform_indices = @transform_1, window_bounds = array<i64: 32, 256>}, {pipeline_mode = #tpu.pipeline_mode<synchronous>, transform_indices = @transform_2, window_bounds = array<i64: 1, 256>}, {transform_indices = @transform_3, window_bounds = array<i64: 16, 1>}, {transform_indices = @transform_4, window_bounds = array<i64: 16, 128>}, {transform_indices = @transform_5, window_bounds = array<i64: 16, 128>}, {transform_indices = @transform_6, window_bounds = array<i64: 1, 8, 128>}]} {
    %c0_i32 = arith.constant 0 : i32
    %0 = arith.cmpi eq, %arg1, %c0_i32 : i32
    %1 = arith.extui %0 : i1 to i32
    %c0_i32_0 = arith.constant 0 : i32
    %2 = arith.cmpi ne, %1, %c0_i32_0 : i32
    scf.if %2 {
      %cst_49 = arith.constant 0.000000e+00 : f32
      %146 = vector.broadcast %cst_49 : f32 to vector<1x8x128xf32>
      %c0_50 = arith.constant 0 : index
      %c0_51 = arith.constant 0 : index
      %c0_52 = arith.constant 0 : index
      %147 = vector.load %arg8[%c0_50, %c0_51, %c0_52] : memref<1x8x128xf32, #tpu.memory_space<vmem>>, vector<1x8x128xf32>
      tpu.vector_store %arg8[%c0_50, %c0_51, %c0_52], %146 {strides = array<i32>} : memref<1x8x128xf32, #tpu.memory_space<vmem>>, vector<1x8x128xf32>,
    } else {
    }
    %c0 = arith.constant 0 : index
    %c0_1 = arith.constant 0 : index
    %3 = vector.load %arg2[%c0, %c0_1] : memref<16x64xf32, #tpu.memory_space<vmem>>, vector<16x32xf32>
    %4 = arith.truncf %3 : vector<16x32xf32> to vector<16x32xbf16>
    %c0_2 = arith.constant 0 : index
    %c0_3 = arith.constant 0 : index
    %5 = vector.load %arg3[%c0_2, %c0_3] : memref<32x256xbf16, #tpu.memory_space<vmem>>, vector<32x256xbf16>
    %cst = arith.constant dense<0.000000e+00> : vector<16x256xf32>
    %6 = tpu.matmul %4, %5, %cst {dimension_numbers = #tpu.dot_dimension_numbers<[1], [0], [0], [1], [0, 0, 1, 1], [], []>} : vector<16x32xbf16>, vector<32x256xbf16>, vector<16x256xf32> -> vector<16x256xf32>
    %c0_4 = arith.constant 0 : index
    %c0_5 = arith.constant 0 : index
    %7 = vector.load %arg4[%c0_4, %c0_5] : memref<1x256xf32, #tpu.memory_space<vmem>>, vector<1x256xf32>
    %8 = vector.broadcast %7 : vector<1x256xf32> to vector<16x256xf32>
    %9 = arith.addf %6, %8 : vector<16x256xf32>
    %10 = vector.extract_strided_slice %9 {offsets = [0, 0], sizes = [16, 128], strides = [1, 1]} : vector<16x256xf32> to vector<16x128xf32>
    %11 = vector.extract_strided_slice %9 {offsets = [0, 128], sizes = [16, 128], strides = [1, 1]} : vector<16x256xf32> to vector<16x128xf32>
    %12 = arith.truncf %10 : vector<16x128xf32> to vector<16x128xbf16>
    %c0_6 = arith.constant 0 : index
    %c0_7 = arith.constant 0 : index
    %13 = vector.load %arg6[%c0_6, %c0_7] : memref<16x128xbf16, #tpu.memory_space<vmem>>, vector<16x128xbf16>
    tpu.vector_store %arg6[%c0_6, %c0_7], %12 {strides = array<i32>} : memref<16x128xbf16, #tpu.memory_space<vmem>>, vector<16x128xbf16>,
    %14 = arith.truncf %11 : vector<16x128xf32> to vector<16x128xbf16>
    %c0_8 = arith.constant 0 : index
    %c0_9 = arith.constant 0 : index
    %15 = vector.load %arg7[%c0_8, %c0_9] : memref<16x128xbf16, #tpu.memory_space<vmem>>, vector<16x128xbf16>
    tpu.vector_store %arg7[%c0_8, %c0_9], %14 {strides = array<i32>} : memref<16x128xbf16, #tpu.memory_space<vmem>>, vector<16x128xbf16>,
    %c0_10 = arith.constant 0 : index
    %c0_11 = arith.constant 0 : index
    %16 = vector.load %arg5[%c0_10, %c0_11] : memref<16x1xi32, #tpu.memory_space<vmem>>, vector<16x1xi32>
    %c1_i32 = arith.constant 1 : i32
    %17 = arith.muli %arg0, %c1_i32 : i32
    %18 = arith.addi %17, %arg1 : i32
    %c16_i32 = arith.constant 16 : i32
    %19 = arith.muli %18, %c16_i32 : i32
    %20 = tpu.iota {dimensions = array<i32: 0>} : vector<16x1xi32>
    %21 = vector.broadcast %19 : i32 to vector<16x1xi32>
    %22 = arith.addi %21, %20 : vector<16x1xi32>
    %c16_i32_12 = arith.constant 16 : i32
    %23 = vector.broadcast %c16_i32_12 : i32 to vector<16x1xi32>
    %24 = arith.cmpi slt, %22, %23 : vector<16x1xi32>
    %c-100_i32 = arith.constant -100 : i32
    %25 = vector.broadcast %c-100_i32 : i32 to vector<16x1xi32>
    %26 = arith.cmpi ne, %16, %25 : vector<16x1xi32>
    %27 = arith.andi %24, %26 : vector<16x1xi1>
    %28 = tpu.iota {dimensions = array<i32: 1>} : vector<16x128xi32>
    %29 = vector.broadcast %16 : vector<16x1xi32> to vector<16x128xi32>
    %30 = arith.cmpi eq, %28, %29 : vector<16x128xi32>
    %cst_13 = arith.constant 0.000000e+00 : f32
    %31 = vector.broadcast %cst_13 : f32 to vector<16x128xf32>
    %32 = arith.select %30, %10, %31 : vector<16x128xi1>, vector<16x128xf32>
    %cst_14 = arith.constant dense<0.000000e+00> : vector<16xf32>
    %33 = vector.multi_reduction <add>, %32, %cst_14 [1] : vector<16x128xf32> to vector<16xf32>
    %34 = vector.shape_cast %33 : vector<16xf32> to vector<16x1xf32>
    %cst_15 = arith.constant 0.000000e+00 : f32
    %35 = vector.broadcast %cst_15 : f32 to vector<16x128xf32>
    %36 = arith.select %30, %11, %35 : vector<16x128xi1>, vector<16x128xf32>
    %cst_16 = arith.constant dense<0.000000e+00> : vector<16xf32>
    %37 = vector.multi_reduction <add>, %36, %cst_16 [1] : vector<16x128xf32> to vector<16xf32>
    %38 = vector.shape_cast %37 : vector<16xf32> to vector<16x1xf32>
    %cst_17 = arith.constant dense<0xFF800000> : vector<16xf32>
    %39 = vector.multi_reduction <maximumf>, %10, %cst_17 [1] : vector<16x128xf32> to vector<16xf32>
    %40 = vector.shape_cast %39 : vector<16xf32> to vector<16x1xf32>
    %41 = vector.broadcast %40 : vector<16x1xf32> to vector<16x128xf32>
    %42 = arith.subf %10, %41 : vector<16x128xf32>
    %43 = math.exp %42 : vector<16x128xf32>
    %cst_18 = arith.constant dense<0.000000e+00> : vector<16xf32>
    %44 = vector.multi_reduction <add>, %43, %cst_18 [1] : vector<16x128xf32> to vector<16xf32>
    %45 = vector.shape_cast %44 : vector<16xf32> to vector<16x1xf32>
    %46 = math.log %45 : vector<16x1xf32>
    %47 = arith.addf %40, %46 : vector<16x1xf32>
    %48 = arith.subf %47, %34 : vector<16x1xf32>
    %cst_19 = arith.constant dense<0xFF800000> : vector<16xf32>
    %49 = vector.multi_reduction <maximumf>, %11, %cst_19 [1] : vector<16x128xf32> to vector<16xf32>
    %50 = vector.shape_cast %49 : vector<16xf32> to vector<16x1xf32>
    %51 = vector.broadcast %50 : vector<16x1xf32> to vector<16x128xf32>
    %52 = arith.subf %11, %51 : vector<16x128xf32>
    %53 = math.exp %52 : vector<16x128xf32>
    %cst_20 = arith.constant dense<0.000000e+00> : vector<16xf32>
    %54 = vector.multi_reduction <add>, %53, %cst_20 [1] : vector<16x128xf32> to vector<16xf32>
    %55 = vector.shape_cast %54 : vector<16xf32> to vector<16x1xf32>
    %56 = math.log %55 : vector<16x1xf32>
    %57 = arith.addf %50, %56 : vector<16x1xf32>
    %58 = arith.subf %57, %38 : vector<16x1xf32>
    %cst_21 = arith.constant 2.500000e-01 : f32
    %59 = vector.broadcast %cst_21 : f32 to vector<16x128xf32>
    %60 = arith.mulf %10, %59 : vector<16x128xf32>
    %cst_22 = arith.constant dense<0xFF800000> : vector<16xf32>
    %61 = vector.multi_reduction <maximumf>, %60, %cst_22 [1] : vector<16x128xf32> to vector<16xf32>
    %62 = vector.shape_cast %61 : vector<16xf32> to vector<16x1xf32>
    %63 = vector.broadcast %62 : vector<16x1xf32> to vector<16x128xf32>
    %64 = arith.subf %60, %63 : vector<16x128xf32>
    %65 = math.exp %64 : vector<16x128xf32>
    %cst_23 = arith.constant dense<0.000000e+00> : vector<16xf32>
    %66 = vector.multi_reduction <add>, %65, %cst_23 [1] : vector<16x128xf32> to vector<16xf32>
    %67 = vector.shape_cast %66 : vector<16xf32> to vector<16x1xf32>
    %68 = vector.broadcast %62 : vector<16x1xf32> to vector<16x128xf32>
    %69 = arith.subf %60, %68 : vector<16x128xf32>
    %70 = math.log %67 : vector<16x1xf32>
    %71 = vector.broadcast %70 : vector<16x1xf32> to vector<16x128xf32>
    %72 = arith.subf %69, %71 : vector<16x128xf32>
    %cst_24 = arith.constant 2.500000e-01 : f32
    %73 = vector.broadcast %cst_24 : f32 to vector<16x128xf32>
    %74 = arith.mulf %11, %73 : vector<16x128xf32>
    %cst_25 = arith.constant dense<0xFF800000> : vector<16xf32>
    %75 = vector.multi_reduction <maximumf>, %74, %cst_25 [1] : vector<16x128xf32> to vector<16xf32>
    %76 = vector.shape_cast %75 : vector<16xf32> to vector<16x1xf32>
    %77 = vector.broadcast %76 : vector<16x1xf32> to vector<16x128xf32>
    %78 = arith.subf %74, %77 : vector<16x128xf32>
    %79 = math.exp %78 : vector<16x128xf32>
    %cst_26 = arith.constant dense<0.000000e+00> : vector<16xf32>
    %80 = vector.multi_reduction <add>, %79, %cst_26 [1] : vector<16x128xf32> to vector<16xf32>
    %81 = vector.shape_cast %80 : vector<16xf32> to vector<16x1xf32>
    %82 = vector.broadcast %76 : vector<16x1xf32> to vector<16x128xf32>
    %83 = arith.subf %74, %82 : vector<16x128xf32>
    %84 = math.log %81 : vector<16x1xf32>
    %85 = vector.broadcast %84 : vector<16x1xf32> to vector<16x128xf32>
    %86 = arith.subf %83, %85 : vector<16x128xf32>
    %87 = tpu.reciprocal %81 {approx = true} : vector<16x1xf32> -> vector<16x1xf32>
    %88 = vector.broadcast %87 : vector<16x1xf32> to vector<16x128xf32>
    %89 = arith.mulf %79, %88 : vector<16x128xf32>
    %90 = arith.subf %86, %72 : vector<16x128xf32>
    %91 = arith.mulf %89, %90 : vector<16x128xf32>
    %cst_27 = arith.constant dense<0.000000e+00> : vector<16xf32>
    %92 = vector.multi_reduction <add>, %91, %cst_27 [1] : vector<16x128xf32> to vector<16xf32>
    %93 = vector.shape_cast %92 : vector<16xf32> to vector<16x1xf32>
    %cst_28 = arith.constant 0.000000e+00 : f32
    %94 = vector.broadcast %cst_28 : f32 to vector<16x1xf32>
    %95 = arith.select %27, %48, %94 : vector<16x1xi1>, vector<16x1xf32>
    %96 = vector.shape_cast %95 : vector<16x1xf32> to vector<1x16x1xf32>
    %cst_29 = arith.constant dense<0.000000e+00> : vector<1xf32>
    %97 = vector.multi_reduction <add>, %96, %cst_29 [1, 2] : vector<1x16x1xf32> to vector<1xf32>
    %98 = vector.shape_cast %97 : vector<1xf32> to vector<1x1x1xf32>
    %99 = vector.extract %98[0, 0, 0] : f32 from vector<1x1x1xf32>
    %cst_30 = arith.constant 0.000000e+00 : f32
    %100 = vector.broadcast %cst_30 : f32 to vector<16x1xf32>
    %101 = arith.select %27, %58, %100 : vector<16x1xi1>, vector<16x1xf32>
    %102 = vector.shape_cast %101 : vector<16x1xf32> to vector<1x16x1xf32>
    %cst_31 = arith.constant dense<0.000000e+00> : vector<1xf32>
    %103 = vector.multi_reduction <add>, %102, %cst_31 [1, 2] : vector<1x16x1xf32> to vector<1xf32>
    %104 = vector.shape_cast %103 : vector<1xf32> to vector<1x1x1xf32>
    %105 = vector.extract %104[0, 0, 0] : f32 from vector<1x1x1xf32>
    %cst_32 = arith.constant 0.000000e+00 : f32
    %106 = vector.broadcast %cst_32 : f32 to vector<16x1xf32>
    %107 = arith.select %24, %93, %106 : vector<16x1xi1>, vector<16x1xf32>
    %108 = vector.shape_cast %107 : vector<16x1xf32> to vector<1x16x1xf32>
    %cst_33 = arith.constant dense<0.000000e+00> : vector<1xf32>
    %109 = vector.multi_reduction <add>, %108, %cst_33 [1, 2] : vector<1x16x1xf32> to vector<1xf32>
    %110 = vector.shape_cast %109 : vector<1xf32> to vector<1x1x1xf32>
    %111 = vector.extract %110[0, 0, 0] : f32 from vector<1x1x1xf32>
    %cst_34 = arith.constant 1.000000e+00 : f32
    %cst_35 = arith.constant 0.000000e+00 : f32
    %112 = vector.broadcast %cst_34 : f32 to vector<16x1xf32>
    %113 = vector.broadcast %cst_35 : f32 to vector<16x1xf32>
    %114 = arith.select %27, %112, %113 : vector<16x1xi1>, vector<16x1xf32>
    %115 = vector.shape_cast %114 : vector<16x1xf32> to vector<1x16x1xf32>
    %cst_36 = arith.constant dense<0.000000e+00> : vector<1xf32>
    %116 = vector.multi_reduction <add>, %115, %cst_36 [1, 2] : vector<1x16x1xf32> to vector<1xf32>
    %117 = vector.shape_cast %116 : vector<1xf32> to vector<1x1x1xf32>
    %118 = vector.extract %117[0, 0, 0] : f32 from vector<1x1x1xf32>
    %119 = tpu.iota {dimensions = array<i32: 2>} : vector<1x8x128xi32>
    %c0_i32_37 = arith.constant 0 : i32
    %120 = vector.broadcast %c0_i32_37 : i32 to vector<1x8x128xi32>
    %121 = arith.cmpi eq, %119, %120 : vector<1x8x128xi32>
    %cst_38 = arith.constant 0.000000e+00 : f32
    %122 = vector.broadcast %99 : f32 to vector<1x8x128xf32>
    %123 = vector.broadcast %cst_38 : f32 to vector<1x8x128xf32>
    %124 = arith.select %121, %122, %123 : vector<1x8x128xi1>, vector<1x8x128xf32>
    %c1_i32_39 = arith.constant 1 : i32
    %125 = vector.broadcast %c1_i32_39 : i32 to vector<1x8x128xi32>
    %126 = arith.cmpi eq, %119, %125 : vector<1x8x128xi32>
    %cst_40 = arith.constant 0.000000e+00 : f32
    %127 = vector.broadcast %105 : f32 to vector<1x8x128xf32>
    %128 = vector.broadcast %cst_40 : f32 to vector<1x8x128xf32>
    %129 = arith.select %126, %127, %128 : vector<1x8x128xi1>, vector<1x8x128xf32>
    %130 = arith.addf %124, %129 : vector<1x8x128xf32>
    %c2_i32 = arith.constant 2 : i32
    %131 = vector.broadcast %c2_i32 : i32 to vector<1x8x128xi32>
    %132 = arith.cmpi eq, %119, %131 : vector<1x8x128xi32>
    %cst_41 = arith.constant 0.000000e+00 : f32
    %133 = vector.broadcast %111 : f32 to vector<1x8x128xf32>
    %134 = vector.broadcast %cst_41 : f32 to vector<1x8x128xf32>
    %135 = arith.select %132, %133, %134 : vector<1x8x128xi1>, vector<1x8x128xf32>
    %136 = arith.addf %130, %135 : vector<1x8x128xf32>
    %c3_i32 = arith.constant 3 : i32
    %137 = vector.broadcast %c3_i32 : i32 to vector<1x8x128xi32>
    %138 = arith.cmpi eq, %119, %137 : vector<1x8x128xi32>
    %cst_42 = arith.constant 0.000000e+00 : f32
    %139 = vector.broadcast %118 : f32 to vector<1x8x128xf32>
    %140 = vector.broadcast %cst_42 : f32 to vector<1x8x128xf32>
    %141 = arith.select %138, %139, %140 : vector<1x8x128xi1>, vector<1x8x128xf32>
    %142 = arith.addf %136, %141 : vector<1x8x128xf32>
    %c0_43 = arith.constant 0 : index
    %c0_44 = arith.constant 0 : index
    %c0_45 = arith.constant 0 : index
    %143 = vector.load %arg8[%c0_43, %c0_44, %c0_45] : memref<1x8x128xf32, #tpu.memory_space<vmem>>, vector<1x8x128xf32>
    %144 = arith.addf %143, %142 : vector<1x8x128xf32>
    %c0_46 = arith.constant 0 : index
    %c0_47 = arith.constant 0 : index
    %c0_48 = arith.constant 0 : index
    %145 = vector.load %arg8[%c0_46, %c0_47, %c0_48] : memref<1x8x128xf32, #tpu.memory_space<vmem>>, vector<1x8x128xf32>
    tpu.vector_store %arg8[%c0_46, %c0_47, %c0_48], %144 {strides = array<i32>} : memref<1x8x128xf32, #tpu.memory_space<vmem>>, vector<1x8x128xf32>,
    return
  }
  func.func @transform_0(%arg0: i32, %arg1: i32) -> (i32, i32) {
    %c1_i32 = arith.constant 1 : i32
    %0 = arith.muli %arg0, %c1_i32 : i32
    %1 = arith.addi %0, %arg1 : i32
    %c0_i32 = arith.constant 0 : i32
    %c0_i32_0 = arith.constant 0 : i32
    return %1, %c0_i32 : i32, i32
  }
  func.func @transform_1(%arg0: i32, %arg1: i32) -> (i32, i32) {
    %c0_i32 = arith.constant 0 : i32
    %c0_i32_0 = arith.constant 0 : i32
    %c0_i32_1 = arith.constant 0 : i32
    return %c0_i32, %c0_i32_0 : i32, i32
  }
  func.func @transform_2(%arg0: i32, %arg1: i32) -> (i32, i32) {
    %c0_i32 = arith.constant 0 : i32
    %c0_i32_0 = arith.constant 0 : i32
    %c0_i32_1 = arith.constant 0 : i32
    return %c0_i32, %c0_i32_0 : i32, i32
  }
  func.func @transform_3(%arg0: i32, %arg1: i32) -> (i32, i32) {
    %c1_i32 = arith.constant 1 : i32
    %0 = arith.muli %arg0, %c1_i32 : i32
    %1 = arith.addi %0, %arg1 : i32
    %c0_i32 = arith.constant 0 : i32
    %c0_i32_0 = arith.constant 0 : i32
    return %1, %c0_i32 : i32, i32
  }
  func.func @transform_4(%arg0: i32, %arg1: i32) -> (i32, i32) {
    %c1_i32 = arith.constant 1 : i32
    %0 = arith.muli %arg0, %c1_i32 : i32
    %1 = arith.addi %0, %arg1 : i32
    %c0_i32 = arith.constant 0 : i32
    %c0_i32_0 = arith.constant 0 : i32
    return %1, %c0_i32 : i32, i32
  }
  func.func @transform_5(%arg0: i32, %arg1: i32) -> (i32, i32) {
    %c1_i32 = arith.constant 1 : i32
    %0 = arith.muli %arg0, %c1_i32 : i32
    %1 = arith.addi %0, %arg1 : i32
    %c0_i32 = arith.constant 0 : i32
    %c0_i32_0 = arith.constant 0 : i32
    return %1, %c0_i32 : i32, i32
  }
  func.func @transform_6(%arg0: i32, %arg1: i32) -> (i32, i32, i32) {
    %c0_i32 = arith.constant 0 : i32
    %c0_i32_0 = arith.constant 0 : i32
    %c0_i32_1 = arith.constant 0 : i32
    return %arg0, %c0_i32, %c0_i32_0 : i32, i32, i32
  }
}

</mosaic_0001>

<bundles_post_ra>
// kernel: tpu_custom_call.1
= control target key start
LH: loop header
LB: loop body
LE: loop exit
PB: predicated region body
PF: predicated region fallthrough
CT: control target
= control target key end

     0   :  { %12 = vsyncpa [#allocation3], 0  ;;  %s863_s0 = inlined_call_operand.vmem [shape: f32[16,64], index: 0, kind: input, shape index: {}]   ;;  %s864_s1 = inlined_call_operand.hbm [shape: bf16[32,256], index: 1, kind: input, shape index: {}]   ;;  %s865_s2 = inlined_call_operand.hbm [shape: f32[1,256], index: 2, kind: input, shape index: {}]   ;;  %s866_s3 = inlined_call_operand.vmem [shape: s32[16,1], index: 3, kind: input, shape index: {}]   ;;  %s867_s4 = inlined_call_operand.hbm [shape: bf16[16,128], index: 4, kind: output, shape index: {0}]   ;;  %s868_s5 = inlined_call_operand.hbm [shape: bf16[16,128], index: 5, kind: output, shape index: {1}]   ;;  %s869_s6 = inlined_call_operand.hbm [shape: f32[1,8,128], index: 6, kind: output, shape index: {2}]  }
   0x1   :  { %13 = vsyncpa [#allocation6], 0 }
   0x2   :  { %14 = vsyncpa [#allocation4], 0 }
   0x3   :  { %15 = vsyncpa [#allocation9], 0  ;;  %s30_s23 = sshll.u32 %s864_s1, 4  ;;  %s682_s24 = smov [#allocation2]   ;;  %s31_s23 = int_to_ptr.hbm [resolvable:$true] %s30_s23 }
   0x4   :  { %s32_s25 = sshll.u32 %s682_s24, 4  ;;  %s44_s28 = sshll.u32 %s865_s2, 4  ;;  %s33_s25 = int_to_ptr.vmem [resolvable:$true] %s32_s25  ;;  %s45_s28 = int_to_ptr.hbm [resolvable:$true] %s44_s28 }
   0x5   :  { %s683_s29 = smov 128   ;;  %s684_s30 = smov 8  }
   0x6   :  { %38 = dma.hbm_to_vmem [thread:$0]  %s31_s23, 512, %s33_s25, [#allocation3], %s683_s29, %s683_s29, %s684_s30  }
   0x7   :  { %s685_s7 = smov [#allocation5]  }
   0x8   :  { %s46_s8 = sshll.u32 %s685_s7, 4  ;;  %s47_s8 = int_to_ptr.vmem [resolvable:$true] %s46_s8 }
   0x9   :  { %49 = dma.hbm_to_vmem [thread:$0]  %s45_s28, 32, %s47_s8, [#allocation6]  }
   0xa   :  { %674 = dma.done.wait [#allocation3], 512  }
   0xb   :  { %675 = vsyncadd [#allocation3], 4294966784 }
   0xc   :  { %676 = dma.done.wait [#allocation6], 32  }
   0xd   :  { %677 = vsyncadd [#allocation6], 4294967264  ;;  %v475_v0 = vld [vmem:[#allocation2 + $0x10] sm:$0xf]  ;;  %v486_v1 = vld [vmem:[#allocation2 + $0x14] sm:$0xf0] }
   0xe   :  { %v485_v2 = vld [vmem:[#allocation2 + $0x14] sm:$0xf]  ;;  %v476_v3 = vor.u32 %v486_v1, %v475_v0  ;;  %v477_v4 = vld [vmem:[#allocation2 + $0x18] sm:$0xf0]  ;;  %v467_v5 = vld [vmem:[#allocation2] sm:$0xf] }
   0xf   :  { %v484_v6 = vld [vmem:[#allocation2 + $0x4] sm:$0xf0]  ;;  %v480_v7 = vor.u32 %v485_v2, %v477_v4  ;;  %v483_v8 = vld [vmem:[#allocation2 + $0x4] sm:$0xf]  ;;  %v469_v9 = vld [vmem:[#allocation2 + $0x8] sm:$0xf0] }
  0x10   :  { %149 = vmatpush.bf16.msra.mxu0 %v476_v3  ;;  %v468_v10 = vor.u32 %v484_v6, %v467_v5  ;;  %v106_v11 = vld [vmem:[%s863_s0] sm:$0xff]  ;;  %v107_v12 = vld [vmem:[%s863_s0 + $0x8] sm:$0xff]  ;;  %v472_v13 = vor.u32 %v483_v8, %v469_v9  ;;  %vm139_vm0 = vcmask 261120   ;;  %v686_v32 = vmov 0   ;;  %s419_s17 = sshll.u32 %s868_s5, 4  ;;  %s689_s18 = smov 64   ;;  %s420_s17 = int_to_ptr.hbm [resolvable:$true] %s419_s17 }
  0x11   :  { %163 = vmatpush.bf16.msra.mxu1 %v480_v7  ;;  %v108_v14 = vpack.c.bf16 %v107_v12, %v106_v11  ;;  %v113_v15 = vld [vmem:[#allocation5] sm:$0x3]  ;;  %517 = vset.pattern.permute.xlu1 %v686_v32  ;;  %v795_v61 = vld [vmem:[%s866_s3 + $0x8] sm:$0xff]  ;;  %v195_v6 = vlaneseq  ;;  %vm319_vm5 = vcmask 7168   ;;  %s690_s19 = smov 4   ;;  %s402_s22 = sshll.u32 %s867_s4, 4  ;;  %s403_s22 = int_to_ptr.hbm [resolvable:$true] %s402_s22 }
  0x12   :  { %v115_v16 = vperm.slane %v113_v15, 0  ;;  %v116_v17 = vperm.slane %v113_v15, 1  ;;  %516 = vset.pattern.permute.xlu0 %v686_v32  ;;  %v802_v63 = vld [vmem:[%s866_s3] sm:$0xff]  ;;  %vm192_vm3 = vcmp.ne.s32.totalorder %v795_v61, 4294967196  ;;  %s688_s3 = smov [#allocation8]   ;;  %s691_s23 = smov [#allocation7]  }
  0x13   :  { %v806_v8 = vand.u32 127, %v195_v6  ;;  %vm191_vm4 = vcmp.ne.s32.totalorder %v802_v63, 4294967196  ;;  %s417_s14 = sshll.u32 %s688_s3, 4  ;;  %s400_s24 = sshll.u32 %s691_s23, 4  ;;  %s418_s14 = int_to_ptr.vmem [resolvable:$true] %s417_s14  ;;  %s401_s24 = int_to_ptr.vmem [resolvable:$true] %s400_s24 }
  0x14   :  { %150 = vmatpush.bf16.msra.mxu0 %v468_v10  ;;  %s692_s27 = smov [#allocation10]   ;;  %s433_s7 = sshll.u32 %s869_s6, 4  ;;  %s434_s7 = int_to_ptr.hbm [resolvable:$true] %s433_s7 }
  0x15   :  { %164 = vmatpush.bf16.msra.mxu1 %v472_v13  ;;  %vm377_vm6 = vcmp.eq.s32.totalorder %v806_v8, 1  ;;  %vm374_vm7 = vcmp.eq.s32.totalorder %v806_v8, 0  ;;  %vm381_vm8 = vcmp.eq.s32.totalorder %v806_v8, 2  ;;  %vm385_vm9 = vcmp.eq.s32.totalorder %v806_v8, 3  ;;  %s431_s28 = sshll.u32 %s692_s27, 4  ;;  %s432_s28 = int_to_ptr.vmem [resolvable:$true] %s431_s28 }
  0x17   :  { %481 = vmatmul.msk.bf16.vlgmr.msra.gmra.mxu0 %vm139_vm0, %v108_v14 }
  0x18   :  { %482 = vmatmul.msk.bf16.vlgmr.msra.gmra.mxu1 %vm139_vm0, %v108_v14 }
  0x94   :  { %v152_v18 = vpop.f32.mrf.mxu0 }
  0x95   :  { %v740_v19 = vadd.f32 %v152_v18, %v115_v16  ;;  %v166_v20 = vpop.f32.mrf.mxu1 }
  0x96   :  { %v742_v21 = vadd.f32 %v166_v20, %v116_v17 }
  0x97   :  { %217 = vmax.xlane.f32.xlu2 %v740_v19  ;;  %v261_v22 = vmul.f32 0.25, %v740_v19 }
  0x98   :  { %v283_v23 = vmul.f32 0.25, %v742_v21 }
  0x99   :  { %263 = vmax.xlane.f32.xlu0 %v261_v22 }
  0x9a   :  { %285 = vmax.xlane.f32.xlu1 %v283_v23 }
  0x9c   :  { %v154_v24 = vpop.f32.mrf.mxu0 }
  0x9d   :  { %v747_v25 = vadd.f32 %v154_v24, %v115_v16  ;;  %v168_v26 = vpop.f32.mrf.mxu1 }
  0x9e   :  { %v749_v27 = vadd.f32 %v168_v26, %v116_v17 }
  0x9f   :  { %219 = vmax.xlane.f32.xlu2 %v747_v25  ;;  %v262_v28 = vmul.f32 0.25, %v747_v25  ;;  %v490_v29 = vpack.c.bf16 %v747_v25, %v740_v19 }
  0xa0   :  { %v284_v30 = vmul.f32 0.25, %v749_v27  ;;  %v495_v31 = vpack.c.bf16 %v749_v27, %v742_v21 }
  0xa1   :  { %265 = vmax.xlane.f32.xlu0 %v262_v28  ;;  %491 = vst [vmem:[#allocation7] sm:$0xff] %v490_v29  }
  0xa2   :  { %287 = vmax.xlane.f32.xlu1 %v284_v30  ;;  %496 = vst [vmem:[#allocation8] sm:$0xff] %v495_v31   ;;  %408 = dma.vmem_to_hbm [thread:$0]  %s401_s24, 128, %s403_s22, [#allocation4], %s689_s18, %s689_s18, %s690_s19  }
  0xa3   :  { %425 = dma.vmem_to_hbm [thread:$0]  %s418_s14, 128, %s420_s17, [#allocation9], %s689_s18, %s689_s18, %s690_s19  }
  0xa9   :  { %239 = vmax.xlane.f32.xlu0 %v742_v21 }
  0xaa   :  { %241 = vmax.xlane.f32.xlu1 %v749_v27 }
 0x10a   :  { %v760_v34 = vpop.xlane.xlu2 %217 }
 0x10b   :  { %v221_v39 = vsub.f32 %v740_v19, %v760_v34 }
 0x10c   :  { %v264_v33 = vpop.xlane.xlu0 %263 }
 0x10d   :  { %v286_v35 = vpop.xlane.xlu1 %285  ;;  %v762_v36 = vsub.f32 %v261_v22, %v264_v33  ;;  %v223_v41 = vmul.f32 1.442695, %v221_v39  ;;  %v687_v39 = vmov 0.0  }
 0x10e   :  { %v764_v37 = vsub.f32 %v283_v23, %v286_v35 }
 0x10f   :  { %v269_v38 = vmul.f32 1.442695, %v762_v36 }
 0x110   :  { %v291_v40 = vmul.f32 1.442695, %v764_v37 }
 0x111   :  { %518 = vpow2.f32 %v269_v38 }
 0x112   :  { %520 = vpow2.f32 %v291_v40  ;;  %v779_v51 = vpop.xlane.xlu2 %219  ;;  %v360_v40 = vsel %vm191_vm4, 1.0, %v687_v39 }
 0x113   :  { %522 = vpow2.f32 %v223_v41  ;;  %v222_v53 = vsub.f32 %v747_v25, %v779_v51  ;;  %v361_v41 = vsel %vm192_vm3, 1.0, %v687_v39 }
 0x114   :  { %v266_v42 = vpop.xlane.xlu0 %265 }
 0x115   :  { %v770_v43 = vsub.f32 %v262_v28, %v266_v42  ;;  %v288_v44 = vpop.xlane.xlu1 %287  ;;  %v225_v54 = vmul.f32 1.442695, %v222_v53  ;;  %v362_v42 = vsel %vm319_vm5, %v360_v40, 0.0 }
 0x116   :  { %v775_v48 = vsub.f32 %v284_v30, %v288_v44 }
 0x117   :  { %v519_v45 = vpop.eup %518  ;;  %v271_v46 = vmul.f32 1.442695, %v770_v43 }
 0x118   :  { %v773_v47 = vpop.eup %520  ;;  %273 = vadd.xlane.f32.xlu2 %v519_v45  ;;  %v293_v49 = vmul.f32 1.442695, %v775_v48 }
 0x119   :  { %524 = vpow2.f32 %v271_v46  ;;  %295 = vadd.xlane.f32.xlu1 %v773_v47  ;;  %v523_v50 = vpop.eup %522 }
 0x11a   :  { %526 = vpow2.f32 %v293_v49 }
 0x11b   :  { %528 = vpow2.f32 %v225_v54 }
 0x11c   :  { %v783_v55 = vpop.xlane.xlu0 %239 }
 0x11d   :  { %v243_v57 = vsub.f32 %v742_v21, %v783_v55  ;;  %v790_v59 = vpop.xlane.xlu1 %241 }
 0x11e   :  { %v244_v62 = vsub.f32 %v749_v27, %v790_v59 }
 0x11f   :  { %v525_v52 = vpop.eup %524  ;;  %v245_v58 = vmul.f32 1.442695, %v243_v57 }
 0x120   :  { %227 = vadd.xlane.f32.xlu2 %v523_v50  ;;  %275 = vadd.xlane.f32.xlu0 %v525_v52  ;;  %v785_v56 = vpop.eup %526  ;;  %v247_v0 = vmul.f32 1.442695, %v244_v62 }
 0x121   :  { %v529_v60 = vpop.eup %528  ;;  %530 = vpow2.f32 %v245_v58 }
 0x122   :  { %532 = vpow2.f32 %v247_v0 }
 0x127   :  { %v531_v1 = vpop.eup %530 }
 0x128   :  { %297 = vadd.xlane.f32.xlu2 %v785_v56  ;;  %v533_v2 = vpop.eup %532 }
 0x130   :  { %229 = vadd.xlane.f32.xlu2 %v529_v60 }
 0x132   :  { %201 = vperm.xlu1 %517, %v795_v61  }
 0x134   :  { %198 = vperm.xlu0 %516, %v802_v63  }
 0x138   :  { %249 = vadd.xlane.f32.xlu2 %v531_v1 }
 0x140   :  { %251 = vadd.xlane.f32.xlu2 %v533_v2 }
 0x18b   :  { %v274_v3 = vpop.xlane.xlu2 %273 }
 0x18c   :  { %v296_v5 = vpop.xlane.xlu1 %295  ;;  %534 = vlog2.f32 %v274_v3 }
 0x18d   :  { %536 = vlog2.f32 %v296_v5 }
 0x192   :  { %v535_v10 = vpop.eup %534 }
 0x193   :  { %v228_v4 = vpop.xlane.xlu2 %227  ;;  %v276_v7 = vpop.xlane.xlu0 %275  ;;  %v278_v18 = vmul.f32 0.6931472, %v535_v10 }
 0x194   :  { %v537_v12 = vpop.eup %536 }
 0x195   :  { %v300_v17 = vmul.f32 0.6931472, %v537_v12  ;;  %v281_v20 = vsub.f32 %v762_v36, %v278_v18 }
 0x197   :  { %v303_v22 = vsub.f32 %v764_v37, %v300_v17 }
 0x19b   :  { %v298_v11 = vpop.xlane.xlu2 %297 }
 0x19c   :  { %538 = vlog2.f32 %v298_v11 }
 0x19d   :  { %540 = vrcp.f32 %v296_v5 }
 0x19e   :  { %542 = vlog2.f32 %v276_v7 }
 0x19f   :  { %544 = vrcp.f32 %v298_v11 }
 0x1a2   :  { %v539_v23 = vpop.eup %538 }
 0x1a3   :  { %v302_v26 = vmul.f32 0.6931472, %v539_v23  ;;  %v230_v37 = vpop.xlane.xlu2 %229 }
 0x1a4   :  { %v202_v9 = vpop.permute.xlu1 %201  ;;  %546 = vlog2.f32 %v230_v37 }
 0x1a5   :  { %vm204_vm1 = vcmp.eq.s32.totalorder %v806_v8, %v202_v9  ;;  %v304_v31 = vsub.f32 %v775_v48, %v302_v26  ;;  %548 = vlog2.f32 %v228_v4 }
 0x1a6   :  { %v206_v13 = vsel %vm204_vm1, %v747_v25, 0.0  ;;  %v199_v14 = vpop.permute.xlu0 %198  ;;  %v212_v24 = vsel %vm204_vm1, %v749_v27, 0.0  ;;  %v541_v25 = vpop.eup %540 }
 0x1a7   :  { %209 = vadd.xlane.f32.xlu2 %v206_v13  ;;  %vm203_vm2 = vcmp.eq.s32.totalorder %v806_v8, %v199_v14  ;;  %v307_v29 = vmul.f32 %v541_v25, %v773_v47 }
 0x1a8   :  { %v211_v15 = vsel %vm203_vm2, %v742_v21, 0.0  ;;  %v205_v16 = vsel %vm203_vm2, %v740_v19, 0.0  ;;  %v543_v21 = vpop.eup %542  ;;  %v309_v19 = vsub.f32 %v303_v22, %v281_v20 }
 0x1a9   :  { %213 = vadd.xlane.f32.xlu0 %v211_v15  ;;  %207 = vadd.xlane.f32.xlu1 %v205_v16  ;;  %v280_v28 = vmul.f32 0.6931472, %v543_v21  ;;  %v545_v33 = vpop.eup %544 }
 0x1aa   :  { %v311_v30 = vmul.f32 %v309_v19, %v307_v29  ;;  %v308_v36 = vmul.f32 %v545_v33, %v785_v56  ;;  %v547_v46 = vpop.eup %546 }
 0x1ab   :  { %v282_v32 = vsub.f32 %v770_v43, %v280_v28  ;;  %v250_v38 = vpop.xlane.xlu2 %249  ;;  %v363_v43 = vsel %vm319_vm5, %v361_v41, 0.0  ;;  %v549_v47 = vpop.eup %548  ;;  %v234_v48 = vmul.f32 0.6931472, %v547_v46 }
 0x1ac   :  { %550 = vlog2.f32 %v250_v38  ;;  %v364_v45 = vadd.f32 %v363_v43, %v362_v42  ;;  %v232_v50 = vmul.f32 0.6931472, %v549_v47 }
 0x1ad   :  { %v310_v35 = vsub.f32 %v304_v31, %v282_v32  ;;  %v236_v53 = vadd.f32 %v234_v48, %v779_v51 }
 0x1ae   :  { %v235_v58 = vadd.f32 %v232_v50, %v760_v34 }
 0x1af   :  { %215 = vadd.xlane.f32.xlu2 %v212_v24  ;;  %v312_v27 = vmul.f32 %v310_v35, %v308_v36 }
 0x1b2   :  { %v551_v49 = vpop.eup %550 }
 0x1b3   :  { %v252_v44 = vpop.xlane.xlu2 %251  ;;  %v254_v52 = vmul.f32 0.6931472, %v551_v49 }
 0x1b4   :  { %552 = vlog2.f32 %v252_v44 }
 0x1b5   :  { %v257_v2 = vadd.f32 %v254_v52, %v783_v55 }
 0x1b7   :  { %313 = vadd.xlane.f32.xlu2 %v311_v30 }
 0x1ba   :  { %v553_v54 = vpop.eup %552 }
 0x1bb   :  { %v256_v0 = vmul.f32 0.6931472, %v553_v54 }
 0x1bd   :  { %v258_v7 = vadd.f32 %v256_v0, %v790_v59 }
 0x1bf   :  { %315 = vadd.xlane.f32.xlu2 %v312_v27 }
 0x21a   :  { %v210_v56 = vpop.xlane.xlu2 %209 }
 0x21b   :  { %v238_v57 = vsub.f32 %v236_v53, %v210_v56 }
 0x21c   :  { %v214_v60 = vpop.xlane.xlu0 %213  ;;  %v208_v62 = vpop.xlane.xlu1 %207 }
 0x21d   :  { %v318_v1 = vsel %vm192_vm3, %v238_v57, 0.0  ;;  %v237_v3 = vsub.f32 %v235_v58, %v208_v62  ;;  %v259_v4 = vsub.f32 %v257_v2, %v214_v60 }
 0x21e   :  { %v321_v6 = vsel %vm319_vm5, %v318_v1, 0.0 }
 0x21f   :  { %v317_v5 = vsel %vm191_vm4, %v237_v3, 0.0  ;;  %v332_v10 = vsel %vm191_vm4, %v259_v4, 0.0 }
 0x220   :  { %v320_v51 = vsel %vm319_vm5, %v317_v5, 0.0  ;;  %v334_v12 = vsel %vm319_vm5, %v332_v10, 0.0 }
 0x221   :  { %v322_v34 = vadd.f32 %v321_v6, %v320_v51 }
 0x222   :  { %v216_v9 = vpop.xlane.xlu2 %215 }
 0x223   :  { %v260_v11 = vsub.f32 %v258_v7, %v216_v9  ;;  %323 = vadd.xlane.f32.xlu2 %v322_v34 }
 0x225   :  { %v333_v55 = vsel %vm192_vm3, %v260_v11, 0.0 }
 0x226   :  { %v335_v13 = vsel %vm319_vm5, %v333_v55, 0.0 }
 0x227   :  { %v336_v14 = vadd.f32 %v335_v13, %v334_v12 }
 0x229   :  { %337 = vadd.xlane.f32.xlu1 %v336_v14 }
 0x22a   :  { %v314_v15 = vpop.xlane.xlu2 %313 }
 0x22b   :  { %v348_v59 = vsel %vm319_vm5, %v314_v15, 0.0 }
 0x231   :  { %365 = vadd.xlane.f32.xlu1 %v364_v45 }
 0x232   :  { %v316_v16 = vpop.xlane.xlu2 %315 }
 0x233   :  { %v349_v17 = vsel %vm319_vm5, %v316_v16, 0.0 }
 0x234   :  { %v350_v63 = vadd.f32 %v349_v17, %v348_v59 }
 0x236   :  { %351 = vadd.xlane.f32.xlu2 %v350_v63 }
 0x296   :  { %v324_v61 = vpop.xlane.xlu2 %323 }
 0x297   :  { %v325_v18 = vrot.slane %v324_v61, 4 }
 0x299   :  { %v326_v20 = vadd.f32 %v325_v18, %v324_v61 }
 0x29b   :  { %v327_v22 = vrot.slane %v326_v20, 2 }
 0x29c   :  { %v338_v23 = vpop.xlane.xlu1 %337 }
 0x29d   :  { %v339_v24 = vrot.slane %v338_v23, 4  ;;  %v328_v25 = vadd.f32 %v327_v22, %v326_v20 }
 0x29f   :  { %v340_v21 = vadd.f32 %v339_v24, %v338_v23  ;;  %v329_v26 = vrot.slane %v328_v25, 1 }
 0x2a1   :  { %v341_v19 = vrot.slane %v340_v21, 2  ;;  %v330_v28 = vadd.f32 %v329_v26, %v328_v25 }
 0x2a3   :  { %497 = vpush %v330_v28  ;;  %v342_v29 = vadd.f32 %v341_v19, %v340_v21 }
 0x2a4   :  { %v366_v30 = vpop.xlane.xlu1 %365 }
 0x2a5   :  { %v367_v31 = vrot.slane %v366_v30, 4  ;;  %v343_v32 = vrot.slane %v342_v29, 1 }
 0x2a7   :  { %v368_v33 = vadd.f32 %v367_v31, %v366_v30  ;;  %v344_v35 = vadd.f32 %v343_v32, %v342_v29 }
 0x2a9   :  { %v369_v36 = vrot.slane %v368_v33, 2  ;;  %v352_v27 = vpop.xlane.xlu2 %351  ;;  %499 = vpush %v344_v35 }
 0x2aa   :  { %v353_v37 = vrot.slane %v352_v27, 4 }
 0x2ab   :  { %v370_v39 = vadd.f32 %v369_v36, %v368_v33 }
 0x2ac   :  { %v354_v38 = vadd.f32 %v353_v37, %v352_v27 }
 0x2ad   :  { %v371_v42 = vrot.slane %v370_v39, 1 }
 0x2ae   :  { %v355_v40 = vrot.slane %v354_v38, 2 }
 0x2af   :  { %v372_v45 = vadd.f32 %v371_v42, %v370_v39 }
 0x2b0   :  { %v356_v41 = vadd.f32 %v355_v40, %v354_v38 }
 0x2b2   :  { %v357_v43 = vrot.slane %v356_v41, 1 }
 0x2b4   :  { %v358_v44 = vadd.f32 %v357_v43, %v356_v41 }
 0x2b6   :  { %501 = vpush %v358_v44 }
 0x2b7   :  { %503 = vpush %v372_v45 }
 0x2d4   :  { %s498_s4 = spop %497 }
 0x2d5   :  { %v375_v47 = vstv %s498_s4 }
 0x2d6   :  { %v376_v49 = vsel %vm374_vm7, %v375_v47, 0.0 }
 0x2da   :  { %s500_s5 = spop %499 }
 0x2db   :  { %v378_v46 = vstv %s500_s5 }
 0x2dc   :  { %v379_v48 = vsel %vm377_vm6, %v378_v46, 0.0 }
 0x2dd   :  { %v380_v50 = vadd.f32 %v379_v48, %v376_v49 }
 0x2e7   :  { %s502_s25 = spop %501 }
 0x2e8   :  { %v382_v52 = vstv %s502_s25  ;;  %s504_s26 = spop %503 }
 0x2e9   :  { %v383_v53 = vsel %vm381_vm8, %v382_v52, 0.0  ;;  %v386_v54 = vstv %s504_s26 }
 0x2ea   :  { %v384_v56 = vadd.f32 %v383_v53, %v380_v50  ;;  %v387_v57 = vsel %vm385_vm9, %v386_v54, 0.0 }
 0x2ec   :  { %v388_v58 = vadd.f32 %v387_v57, %v384_v56 }
 0x2ee   :  { %391 = vst [vmem:[#allocation10] sm:$0xff] %v388_v58 }
 0x2ef   :  { %436 = dma.vmem_to_hbm [thread:$0]  %s432_s28, 128, %s434_s7, [#allocation9]  }
 0x2f0   :  { %678 = dma.done.wait [#allocation4], 128  }
 0x2f1   :  { %679 = vsyncadd [#allocation4], 4294967168 }
 0x2f2   :  { %680 = dma.done.wait [#allocation9], 256  }
 0x2f3   :  { %681 = vsyncadd [#allocation9], 4294967040 }
 0x2f4   :  { %449 = vsyncpa [#allocation3], 1 }
 0x2f5   :  { %450 = vsyncpa [#allocation6], 1 }
 0x2f6   :  { %451 = vsyncpa [#allocation4], 1 }
 0x2f7   :  { %452 = vsyncpa [#allocation9], 1 }

</bundles_post_ra>
